<compile_context>
chip_gen: v6e
topology: v6e:2x2x1
jax: 0.10.0
libtpu: 0.0.40
codegen_flags: <defaults>
</compile_context>

<pallas_src>
import jax
import jax.numpy as jnp
from jax import lax
from jax.experimental import pallas as pl
from jax.experimental.pallas import tpu as pltpu

HIDDEN = 128
LN_EPS = 1e-5      # torch.nn.LayerNorm default
NORM_EPS = 1e-8    # Normalizer eps

# Packed-param slab row indices ([8,128] resident slab)
_ROW_B1, _ROW_B2, _ROW_B3, _ROW_G, _ROW_BETA, _ROW_W1N = 0, 1, 2, 3, 4, 5
_SLAB_ROWS = 8


def _cdiv(a, b):
    return (a + b - 1) // b


def _round8(n):
    return ((n + 7) // 8) * 8


# ----------------------------------------------------------------------------
# Shared MLP tail: ReLU -> L2 -> ReLU -> L3 -> LayerNorm (bf16 MXU, f32 acc)
# ----------------------------------------------------------------------------
def _mlp_tail(h, w2_ref, w3_ref, p_ref, o_ref):
    h = jnp.maximum(h, 0.0)
    h = jnp.dot(h.astype(jnp.bfloat16), w2_ref[...],
                preferred_element_type=jnp.float32) + p_ref[_ROW_B2:_ROW_B2 + 1, :]
    h = jnp.maximum(h, 0.0)
    h = jnp.dot(h.astype(jnp.bfloat16), w3_ref[...],
                preferred_element_type=jnp.float32) + p_ref[_ROW_B3:_ROW_B3 + 1, :]
    # LayerNorm over feature axis (128), f32 statistics.
    mu = jnp.mean(h, axis=-1, keepdims=True)
    var = jnp.mean((h - mu) ** 2, axis=-1, keepdims=True)
    hn = (h - mu) * lax.rsqrt(var + LN_EPS)
    o_ref[...] = (hn * p_ref[_ROW_G:_ROW_G + 1, :]
                  + p_ref[_ROW_BETA:_ROW_BETA + 1, :]).astype(o_ref.dtype)


# ----------------------------------------------------------------------------
# Node kernel: fused concat([velocity, node_type]) + Normalizer(folded) + MLP
# ----------------------------------------------------------------------------
def _node_kernel(vel_ref, nt_ref, w1v_ref, w1t_ref, w2_ref, w3_ref, p_ref, o_ref):
    # Layer 1 in f32 (tiny K; avoids bf16 amplification of folded inv_std).
    h = (jnp.dot(vel_ref[...], w1v_ref[...], preferred_element_type=jnp.float32)
         + jnp.dot(nt_ref[...], w1t_ref[...], preferred_element_type=jnp.float32)
         + p_ref[_ROW_B1:_ROW_B1 + 1, :])
    _mlp_tail(h, w2_ref, w3_ref, p_ref, o_ref)


# ----------------------------------------------------------------------------
# Edge kernel: fused distance/norm + Normalizer(folded) + MLP
# Layer 1 done as VPU broadcast-FMAs (K=2 plus a rank-1 norm term).
# ----------------------------------------------------------------------------
def _edge_kernel(snd_ref, rcv_ref, w1d_ref, w2_ref, w3_ref, p_ref, o_ref):
    d = snd_ref[...] - rcv_ref[...]                                  # [tm, 2]
    nrm = jnp.sqrt(jnp.sum(d * d, axis=-1, keepdims=True))           # [tm, 1]
    h = (d[:, 0:1] * w1d_ref[0:1, :]
         + d[:, 1:2] * w1d_ref[1:2, :]
         + nrm * p_ref[_ROW_W1N:_ROW_W1N + 1, :]
         + p_ref[_ROW_B1:_ROW_B1 + 1, :])
    _mlp_tail(h, w2_ref, w3_ref, p_ref, o_ref)


# ----------------------------------------------------------------------------
# Parameter folding / packing
# ----------------------------------------------------------------------------
def _fold_base(params):
    """Fold the Normalizer (mean/std) into the first Linear."""
    inv_std = 1.0 / (params["std"] + NORM_EPS)                    # [1, Din]
    w1f = params["w1"] * inv_std.reshape(-1, 1)                   # [Din, 128], f32
    b1f = params["b1"] - (params["mean"] * inv_std) @ params["w1"]  # [1, 128]
    return w1f, b1f


def _pack_slab(b1f, params, extra_rows=()):
    slab = jnp.zeros((_SLAB_ROWS, HIDDEN), jnp.float32)
    slab = slab.at[_ROW_B1].set(b1f[0])
    slab = slab.at[_ROW_B2].set(params["b2"][0])
    slab = slab.at[_ROW_B3].set(params["b3"][0])
    slab = slab.at[_ROW_G].set(params["ln_g"][0])
    slab = slab.at[_ROW_BETA].set(params["ln_b"][0])
    for row, vec in extra_rows:
        slab = slab.at[row].set(vec)
    return slab


def _fold_node_params(params, state_size):
    w1f, b1f = _fold_base(params)
    w1v = w1f[:state_size]          # [S, 128] f32
    w1t = w1f[state_size:]          # [9, 128] f32
    slab = _pack_slab(b1f, params)
    return (w1v, w1t,
            params["w2"].astype(jnp.bfloat16),
            params["w3"].astype(jnp.bfloat16), slab)


def _fold_edge_params(params):
    w1f, b1f = _fold_base(params)
    w1d = w1f[:2]                   # [2, 128] f32 (distance rows)
    w1n = w1f[2]                    # [128]    f32 (norm row -> slab)
    slab = _pack_slab(b1f, params, extra_rows=[(_ROW_W1N, w1n)])
    return (w1d,
            params["w2"].astype(jnp.bfloat16),
            params["w3"].astype(jnp.bfloat16), slab)


# ----------------------------------------------------------------------------
# Row-tile selection
# ----------------------------------------------------------------------------
def _pick_tm(M, tm):
    # Big tiles amortize per-step overhead; never over-pad tiny inputs.
    tm = max(8, min(tm, _round8(M)))
    # Keep >= 2 grid steps when possible so both v7x TensorCores get work
    # (no-op on single-TC v5e/v6e).
    if M > 8 and _cdiv(M, tm) < 2:
        tm = max(8, _round8(_cdiv(M, 2)))
    return tm


_VMEM_SPEC = pl.BlockSpec(memory_space=pltpu.MemorySpace.VMEM)  # resident, un-pipelined


# ----------------------------------------------------------------------------
# Wrappers
# ----------------------------------------------------------------------------
def node_norm_mlp(velocity, node_type, params, *, tm=1024, out_dtype=jnp.float32):
    """velocity [M,S], node_type [M,9] -> [M,128] (fused concat+Normalizer+MLP)."""
    M, S = velocity.shape
    T = node_type.shape[1]
    tm = _pick_tm(M, tm)
    w1v, w1t, w2, w3, slab = _fold_node_params(params, S)

    return pl.pallas_call(
        _node_kernel,
        out_shape=jax.ShapeDtypeStruct((M, HIDDEN), out_dtype),
        grid_spec=pltpu.PrefetchScalarGridSpec(
            num_scalar_prefetch=0,
            grid=(_cdiv(M, tm),),           # ragged final tile masked by Pallas
            in_specs=[pl.BlockSpec((tm, S), lambda i: (i, 0)),
                      pl.BlockSpec((tm, T), lambda i: (i, 0)),
                      _VMEM_SPEC, _VMEM_SPEC, _VMEM_SPEC, _VMEM_SPEC, _VMEM_SPEC],
            out_specs=pl.BlockSpec((tm, HIDDEN), lambda i: (i, 0)),
        ),
        compiler_params=pltpu.CompilerParams(dimension_semantics=("parallel",)),
    )(velocity, node_type, w1v, w1t, w2, w3, slab)


def edge_norm_mlp(senders, receivers, params, *, tm=1024, out_dtype=jnp.float32):
    """senders/receivers [M,2] -> [M,128] (fused distance/norm+Normalizer+MLP)."""
    M, _ = senders.shape
    tm = _pick_tm(M, tm)
    w1d, w2, w3, slab = _fold_edge_params(params)

    return pl.pallas_call(
        _edge_kernel,
        out_shape=jax.ShapeDtypeStruct((M, HIDDEN), out_dtype),
        grid_spec=pltpu.PrefetchScalarGridSpec(
            num_scalar_prefetch=0,
            grid=(_cdiv(M, tm),),
            in_specs=[pl.BlockSpec((tm, 2), lambda i: (i, 0)),
                      pl.BlockSpec((tm, 2), lambda i: (i, 0)),
                      _VMEM_SPEC, _VMEM_SPEC, _VMEM_SPEC, _VMEM_SPEC],
            out_specs=pl.BlockSpec((tm, HIDDEN), lambda i: (i, 0)),
        ),
        compiler_params=pltpu.CompilerParams(dimension_semantics=("parallel",)),
    )(senders, receivers, w1d, w2, w3, slab)


# ----------------------------------------------------------------------------
# Parameter construction (deterministic, synthetic)
# ----------------------------------------------------------------------------
def make_mlp_params(key, input_size):
    ks = jax.random.split(key, 6)

    def lin(kw, kb, fan_in, fan_out):
        bound = 1.0 / jnp.sqrt(jnp.asarray(fan_in, jnp.float32))
        w = jax.random.uniform(kw, (fan_in, fan_out), jnp.float32, -bound, bound)
        b = jax.random.uniform(kb, (1, fan_out), jnp.float32, -bound, bound)
        return w, b

    w1, b1 = lin(ks[0], ks[1], input_size, HIDDEN)
    w2, b2 = lin(ks[2], ks[3], HIDDEN, HIDDEN)
    w3, b3 = lin(ks[4], ks[5], HIDDEN, HIDDEN)
    return {
        # Normalizer buffers: fresh module => mean=0, std=1
        # TODO(synk): training-mode running-stat accumulation (Normalizer.count
        # and accumulation buffers) is a stateful side effect not reproduced here.
        "mean": jnp.zeros((1, input_size), jnp.float32),
        "std": jnp.ones((1, input_size), jnp.float32),
        "w1": w1, "b1": b1, "w2": w2, "b2": b2, "w3": w3, "b3": b3,
        "ln_g": jnp.ones((1, HIDDEN), jnp.float32),
        "ln_b": jnp.zeros((1, HIDDEN), jnp.float32),
    }


# ----------------------------------------------------------------------------
# Encoder forward
# ----------------------------------------------------------------------------
def encoder_forward(mesh_pos, edges, node_type, velocity, fv_params, fe_params,
                    *, out_dtype=jnp.float32):
    B, N, _ = mesh_pos.shape
    E = edges.shape[1]
    S = velocity.shape[-1]

    # Edge endpoint gather stays in XLA (data-dependent indices); distance,
    # norm and the feature concats are fused into the Pallas kernels.
    snd_idx = jnp.repeat(edges[..., 0:1], 2, axis=-1)             # [B, E, 2]
    rcv_idx = jnp.repeat(edges[..., 1:2], 2, axis=-1)
    senders = jnp.take_along_axis(mesh_pos, snd_idx, axis=1)      # [B, E, 2]
    receivers = jnp.take_along_axis(mesh_pos, rcv_idx, axis=1)

    # TODO(synk): for latency-bound tiny meshes, merge the node and edge
    # encoders into a single pallas_call (pad Din, stack rows, scalar-prefetch
    # the per-stream weight select) to save one kernel launch.
    V_out = node_norm_mlp(velocity.reshape(B * N, S),
                          node_type.reshape(B * N, -1),
                          fv_params, out_dtype=out_dtype).reshape(B, N, HIDDEN)
    E_out = edge_norm_mlp(senders.reshape(B * E, 2),
                          receivers.reshape(B * E, 2),
                          fe_params, out_dtype=out_dtype).reshape(B, E, HIDDEN)
    return V_out, E_out


# Pure-JAX f32 reference for sanity checking the kernel math.
def _ref_norm_mlp(x, p):
    xn = (x - p["mean"]) / (p["std"] + NORM_EPS)
    h = jnp.maximum(xn @ p["w1"] + p["b1"], 0.0)
    h = jnp.maximum(h @ p["w2"] + p["b2"], 0.0)
    h = h @ p["w3"] + p["b3"]
    mu = jnp.mean(h, axis=-1, keepdims=True)
    var = jnp.mean((h - mu) ** 2, axis=-1, keepdims=True)
    return (h - mu) * lax.rsqrt(var + LN_EPS) * p["ln_g"] + p["ln_b"]


if __name__ == "__main__":
    state_size = 4
    B, N, NE = 2, 16, 24

    key = jax.random.PRNGKey(0)
    k_pos, k_edge, k_type, k_vel, k_fv, k_fe = jax.random.split(key, 6)

    mesh_pos = jax.random.normal(k_pos, (B, N, 2), jnp.float32)
    edges = jax.random.randint(k_edge, (B, NE, 2), 0, N, jnp.int32)
    node_type = jax.nn.one_hot(
        jax.random.randint(k_type, (B, N), 0, 9), 9, dtype=jnp.float32)
    velocity = jax.random.normal(k_vel, (B, N, state_size), jnp.float32)

    fv_params = make_mlp_params(k_fv, 9 + state_size)  # node MLP: Din = 13
    fe_params = make_mlp_params(k_fe, 3)                # edge MLP: Din = 3

    V, Eo = encoder_forward(mesh_pos, edges, node_type, velocity,
                            fv_params, fe_params)
    jax.block_until_ready((V, Eo))

    # Sanity check against pure-JAX f32 reference (layers 2-3 use bf16 MXU
    # operands with f32 accumulation, hence the loose tolerance).
    V_ref = _ref_norm_mlp(
        jnp.concatenate([velocity, node_type], -1).reshape(B * N, -1),
        fv_params).reshape(B, N, HIDDEN)

    snd = jnp.take_along_axis(mesh_pos, jnp.repeat(edges[..., 0:1], 2, -1), 1)
    rcv = jnp.take_along_axis(mesh_pos, jnp.repeat(edges[..., 1:2], 2, -1), 1)
    dist = snd - rcv
    # TODO(synk): zero-length (self) edges give a NaN *gradient* through sqrt;
    # forward pass matches the PyTorch module exactly.
    E_in_ref = jnp.concatenate(
        [dist, jnp.sqrt(jnp.sum(dist ** 2, -1, keepdims=True))], -1)
    E_ref = _ref_norm_mlp(E_in_ref.reshape(B * NE, -1),
                          fe_params).reshape(B, NE, HIDDEN)

    assert V.shape == (B, N, HIDDEN) and Eo.shape == (B, NE, HIDDEN)
    assert jnp.allclose(V, V_ref, atol=5e-2, rtol=5e-2)
    assert jnp.allclose(Eo, E_ref, atol=5e-2, rtol=5e-2)

    print("KERNEL_OK")
</pallas_src>

<mosaic_0001>
module attributes {stable_mosaic.version = 11 : i64} {
  func.func @_node_kernel(%arg0: i32, %arg1: memref<16x4xf32, #tpu.memory_space<vmem>>, %arg2: memref<16x9xf32, #tpu.memory_space<vmem>>, %arg3: memref<4x128xf32, #tpu.memory_space<vmem>>, %arg4: memref<9x128xf32, #tpu.memory_space<vmem>>, %arg5: memref<128x128xbf16, #tpu.memory_space<vmem>>, %arg6: memref<128x128xbf16, #tpu.memory_space<vmem>>, %arg7: memref<8x128xf32, #tpu.memory_space<vmem>>, %arg8: memref<16x128xf32, #tpu.memory_space<vmem>>) attributes {dimension_semantics = [#tpu.dimension_semantics<parallel>], iteration_bounds = array<i64: 2>, scalar_prefetch = 0 : i64, scratch_operands = 0 : i64, tpu.core_type = #tpu.core_type<tc>, window_params = [{transform_indices = @transform_0, window_bounds = array<i64: 16, 4>}, {transform_indices = @transform_1, window_bounds = array<i64: 16, 9>}, {pipeline_mode = #tpu.pipeline_mode<synchronous>, transform_indices = @transform_2, window_bounds = array<i64: 4, 128>}, {pipeline_mode = #tpu.pipeline_mode<synchronous>, transform_indices = @transform_3, window_bounds = array<i64: 9, 128>}, {pipeline_mode = #tpu.pipeline_mode<synchronous>, transform_indices = @transform_4, window_bounds = array<i64: 128, 128>}, {pipeline_mode = #tpu.pipeline_mode<synchronous>, transform_indices = @transform_5, window_bounds = array<i64: 128, 128>}, {pipeline_mode = #tpu.pipeline_mode<synchronous>, transform_indices = @transform_6, window_bounds = array<i64: 8, 128>}, {transform_indices = @transform_7, window_bounds = array<i64: 16, 128>}]} {
    %c0 = arith.constant 0 : index
    %c0_0 = arith.constant 0 : index
    %0 = vector.load %arg1[%c0, %c0_0] : memref<16x4xf32, #tpu.memory_space<vmem>>, vector<16x4xf32>
    %c0_1 = arith.constant 0 : index
    %c0_2 = arith.constant 0 : index
    %1 = vector.load %arg3[%c0_1, %c0_2] : memref<4x128xf32, #tpu.memory_space<vmem>>, vector<4x128xf32>
    %cst = arith.constant dense<0.000000e+00> : vector<16x128xf32>
    %2 = tpu.matmul %0, %1, %cst {dimension_numbers = #tpu.dot_dimension_numbers<[1], [0], [0], [1], [0, 0, 1, 1], [], []>} : vector<16x4xf32>, vector<4x128xf32>, vector<16x128xf32> -> vector<16x128xf32>
    %c0_3 = arith.constant 0 : index
    %c0_4 = arith.constant 0 : index
    %3 = vector.load %arg2[%c0_3, %c0_4] : memref<16x9xf32, #tpu.memory_space<vmem>>, vector<16x9xf32>
    %c0_5 = arith.constant 0 : index
    %c0_6 = arith.constant 0 : index
    %4 = vector.load %arg4[%c0_5, %c0_6] : memref<9x128xf32, #tpu.memory_space<vmem>>, vector<9x128xf32>
    %cst_7 = arith.constant dense<0.000000e+00> : vector<16x128xf32>
    %5 = tpu.matmul %3, %4, %cst_7 {dimension_numbers = #tpu.dot_dimension_numbers<[1], [0], [0], [1], [0, 0, 1, 1], [], []>} : vector<16x9xf32>, vector<9x128xf32>, vector<16x128xf32> -> vector<16x128xf32>
    %6 = arith.addf %2, %5 : vector<16x128xf32>
    %c0_8 = arith.constant 0 : index
    %c0_9 = arith.constant 0 : index
    %7 = vector.load %arg7[%c0_8, %c0_9] : memref<8x128xf32, #tpu.memory_space<vmem>>, vector<1x128xf32>
    %8 = vector.broadcast %7 : vector<1x128xf32> to vector<16x128xf32>
    %9 = arith.addf %6, %8 : vector<16x128xf32>
    %cst_10 = arith.constant 0.000000e+00 : f32
    %10 = vector.broadcast %cst_10 : f32 to vector<16x128xf32>
    %11 = arith.maximumf %9, %10 : vector<16x128xf32>
    %12 = arith.truncf %11 : vector<16x128xf32> to vector<16x128xbf16>
    %c0_11 = arith.constant 0 : index
    %c0_12 = arith.constant 0 : index
    %13 = vector.load %arg5[%c0_11, %c0_12] : memref<128x128xbf16, #tpu.memory_space<vmem>>, vector<128x128xbf16>
    %cst_13 = arith.constant dense<0.000000e+00> : vector<16x128xf32>
    %14 = tpu.matmul %12, %13, %cst_13 {dimension_numbers = #tpu.dot_dimension_numbers<[1], [0], [0], [1], [0, 0, 1, 1], [], []>} : vector<16x128xbf16>, vector<128x128xbf16>, vector<16x128xf32> -> vector<16x128xf32>
    %c1 = arith.constant 1 : index
    %c0_14 = arith.constant 0 : index
    %15 = vector.load %arg7[%c1, %c0_14] : memref<8x128xf32, #tpu.memory_space<vmem>>, vector<1x128xf32>
    %16 = vector.broadcast %15 : vector<1x128xf32> to vector<16x128xf32>
    %17 = arith.addf %14, %16 : vector<16x128xf32>
    %cst_15 = arith.constant 0.000000e+00 : f32
    %18 = vector.broadcast %cst_15 : f32 to vector<16x128xf32>
    %19 = arith.maximumf %17, %18 : vector<16x128xf32>
    %20 = arith.truncf %19 : vector<16x128xf32> to vector<16x128xbf16>
    %c0_16 = arith.constant 0 : index
    %c0_17 = arith.constant 0 : index
    %21 = vector.load %arg6[%c0_16, %c0_17] : memref<128x128xbf16, #tpu.memory_space<vmem>>, vector<128x128xbf16>
    %cst_18 = arith.constant dense<0.000000e+00> : vector<16x128xf32>
    %22 = tpu.matmul %20, %21, %cst_18 {dimension_numbers = #tpu.dot_dimension_numbers<[1], [0], [0], [1], [0, 0, 1, 1], [], []>} : vector<16x128xbf16>, vector<128x128xbf16>, vector<16x128xf32> -> vector<16x128xf32>
    %c2 = arith.constant 2 : index
    %c0_19 = arith.constant 0 : index
    %23 = vector.load %arg7[%c2, %c0_19] : memref<8x128xf32, #tpu.memory_space<vmem>>, vector<1x128xf32>
    %24 = vector.broadcast %23 : vector<1x128xf32> to vector<16x128xf32>
    %25 = arith.addf %22, %24 : vector<16x128xf32>
    %cst_20 = arith.constant dense<0.000000e+00> : vector<16xf32>
    %26 = vector.multi_reduction <add>, %25, %cst_20 [1] : vector<16x128xf32> to vector<16xf32>
    %27 = vector.shape_cast %26 : vector<16xf32> to vector<16x1xf32>
    %cst_21 = arith.constant 1.280000e+02 : f32
    %28 = vector.broadcast %cst_21 : f32 to vector<16x1xf32>
    %29 = arith.divf %27, %28 : vector<16x1xf32>
    %30 = vector.broadcast %29 : vector<16x1xf32> to vector<16x128xf32>
    %31 = arith.subf %25, %30 : vector<16x128xf32>
    %32 = arith.mulf %31, %31 : vector<16x128xf32>
    %cst_22 = arith.constant dense<0.000000e+00> : vector<16xf32>
    %33 = vector.multi_reduction <add>, %32, %cst_22 [1] : vector<16x128xf32> to vector<16xf32>
    %34 = vector.shape_cast %33 : vector<16xf32> to vector<16x1xf32>
    %cst_23 = arith.constant 1.280000e+02 : f32
    %35 = vector.broadcast %cst_23 : f32 to vector<16x1xf32>
    %36 = arith.divf %34, %35 : vector<16x1xf32>
    %37 = vector.broadcast %29 : vector<16x1xf32> to vector<16x128xf32>
    %38 = arith.subf %25, %37 : vector<16x128xf32>
    %cst_24 = arith.constant 9.99999974E-6 : f32
    %39 = vector.broadcast %cst_24 : f32 to vector<16x1xf32>
    %40 = arith.addf %36, %39 : vector<16x1xf32>
    %41 = math.rsqrt %40 : vector<16x1xf32>
    %42 = vector.broadcast %41 : vector<16x1xf32> to vector<16x128xf32>
    %43 = arith.mulf %38, %42 : vector<16x128xf32>
    %c3 = arith.constant 3 : index
    %c0_25 = arith.constant 0 : index
    %44 = vector.load %arg7[%c3, %c0_25] : memref<8x128xf32, #tpu.memory_space<vmem>>, vector<1x128xf32>
    %45 = vector.broadcast %44 : vector<1x128xf32> to vector<16x128xf32>
    %46 = arith.mulf %43, %45 : vector<16x128xf32>
    %c4 = arith.constant 4 : index
    %c0_26 = arith.constant 0 : index
    %47 = vector.load %arg7[%c4, %c0_26] : memref<8x128xf32, #tpu.memory_space<vmem>>, vector<1x128xf32>
    %48 = vector.broadcast %47 : vector<1x128xf32> to vector<16x128xf32>
    %49 = arith.addf %46, %48 : vector<16x128xf32>
    %c0_27 = arith.constant 0 : index
    %c0_28 = arith.constant 0 : index
    %50 = vector.load %arg8[%c0_27, %c0_28] : memref<16x128xf32, #tpu.memory_space<vmem>>, vector<16x128xf32>
    tpu.vector_store %arg8[%c0_27, %c0_28], %49 {strides = array<i32>} : memref<16x128xf32, #tpu.memory_space<vmem>>, vector<16x128xf32>,
    return
  }
  func.func @transform_0(%arg0: i32) -> (i32, i32) {
    %c0_i32 = arith.constant 0 : i32
    %c0_i32_0 = arith.constant 0 : i32
    return %arg0, %c0_i32 : i32, i32
  }
  func.func @transform_1(%arg0: i32) -> (i32, i32) {
    %c0_i32 = arith.constant 0 : i32
    %c0_i32_0 = arith.constant 0 : i32
    return %arg0, %c0_i32 : i32, i32
  }
  func.func @transform_2(%arg0: i32) -> (i32, i32) {
    %c0_i32 = arith.constant 0 : i32
    %c0_i32_0 = arith.constant 0 : i32
    %c0_i32_1 = arith.constant 0 : i32
    return %c0_i32, %c0_i32_0 : i32, i32
  }
  func.func @transform_3(%arg0: i32) -> (i32, i32) {
    %c0_i32 = arith.constant 0 : i32
    %c0_i32_0 = arith.constant 0 : i32
    %c0_i32_1 = arith.constant 0 : i32
    return %c0_i32, %c0_i32_0 : i32, i32
  }
  func.func @transform_4(%arg0: i32) -> (i32, i32) {
    %c0_i32 = arith.constant 0 : i32
    %c0_i32_0 = arith.constant 0 : i32
    %c0_i32_1 = arith.constant 0 : i32
    return %c0_i32, %c0_i32_0 : i32, i32
  }
  func.func @transform_5(%arg0: i32) -> (i32, i32) {
    %c0_i32 = arith.constant 0 : i32
    %c0_i32_0 = arith.constant 0 : i32
    %c0_i32_1 = arith.constant 0 : i32
    return %c0_i32, %c0_i32_0 : i32, i32
  }
  func.func @transform_6(%arg0: i32) -> (i32, i32) {
    %c0_i32 = arith.constant 0 : i32
    %c0_i32_0 = arith.constant 0 : i32
    %c0_i32_1 = arith.constant 0 : i32
    return %c0_i32, %c0_i32_0 : i32, i32
  }
  func.func @transform_7(%arg0: i32) -> (i32, i32) {
    %c0_i32 = arith.constant 0 : i32
    %c0_i32_0 = arith.constant 0 : i32
    return %arg0, %c0_i32 : i32, i32
  }
}

</mosaic_0001>

<bundles_post_ra>
// kernel: tpu_custom_call.1
= control target key start
LH: loop header
LB: loop body
LE: loop exit
PB: predicated region body
PF: predicated region fallthrough
CT: control target
= control target key end

     0   :  { %12 = vsyncpa [#allocation3], 0  ;;  %s1462_s0 = inlined_call_operand.vmem [shape: f32[32,4], index: 0, kind: input, shape index: {}]   ;;  %s1463_s1 = inlined_call_operand.vmem [shape: f32[32,9], index: 1, kind: input, shape index: {}]   ;;  %s1464_s2 = inlined_call_operand.hbm [shape: f32[4,128], index: 2, kind: input, shape index: {}]   ;;  %s1465_s3 = inlined_call_operand.vmem [shape: f32[9,128], index: 3, kind: input, shape index: {}]   ;;  %s1466_s4 = inlined_call_operand.vmem [shape: bf16[128,128], index: 4, kind: input, shape index: {}]   ;;  %s1467_s5 = inlined_call_operand.hbm [shape: bf16[128,128], index: 5, kind: input, shape index: {}]   ;;  %s1468_s6 = inlined_call_operand.vmem [shape: f32[8,128], index: 6, kind: input, shape index: {}]   ;;  %s1469_s7 = inlined_call_operand.hbm [shape: f32[32,128], index: 7, kind: output, shape index: {}]  }
   0x1   :  { %13 = vsyncpa [#allocation6], 0 }
   0x2   :  { %14 = vsyncpa [#allocation4], 0 }
   0x3   :  { %16 = vsyncpa [#allocation4 + $0x1], 0  ;;  %s1272_s24 = smov 0   ;;  %s1274_s25 = smov 0  }
   0x4   :  { %s1276_s26 = smov 0   ;;  %s1278_s27 = smov 0  }
   0x5 LB: > { %s1293_s28 = sadd.s32 4294967295, %s1221_s27   ;;  %s892_s29 = sadd.s32 4294967294, %s1221_s27   ;;  %s1221_s27 = sphi %s1278_s27, %s1487_s27   ;;  %s1217_s26 = sphi %s1276_s26, %s1486_s26   ;;  %s1213_s25 = sphi %s1274_s25, %s1485_s25   ;;  %s1209_s24 = sphi %s1272_s24, %s1484_s24  }
   0x6   : > { %s1297_s30 = sadd.s32 1, %s1221_s27   ;;  %s186_s8 = sadd.s32 1, %s1217_s26 }
   0x7   : > { %s183_s9 = ssub.s32 %s1221_s27, %s1297_s30  ;;  %p196_p0 = scmp.ne.s32.totalorder %s1217_s26, %s1213_s25 }
   0x8   : > { %p184_p1 = scmp.eq.s32.totalorder %s183_s9, 0  ;;  %p197_p2 = scmp.eq.s32.totalorder %s1293_s28, 1 }
   0x9   : > { %p202_p3 = scmp.ne.s32.totalorder %s1213_s25, %s1209_s24  ;;  %p203_p4 = scmp.eq.s32.totalorder %s892_s29, 1 }
   0xa   : > { %s1308_s10 = scalar_select %p184_p1, %s1217_s26, %s186_s8  }
   0xb   : > { %p1310_p5 = por %p197_p2, %p196_p0  ;;  %p1314_p6 = por %p203_p4, %p202_p3 }
   0xc   : > { %p893_p7 = scmp.ge.s32.totalorder %s1221_s27, 1  ;;  %p210_p8 = scmp.lt.s32.totalorder %s1221_s27, 3 }
   0xd   : > { %s1473_s11 = scalar_select %p1310_p5, 1, 0 }
   0xe   : > { %s1474_s12 = scalar_select %p1314_p6, 1, 0 }
   0xf   : > { %p1470_p9 = scmp.eq.s32.totalorder %s1293_s28, 0  ;;  %p1321_p10 = pnand %p893_p7, %p210_p8 }
  0x10   : > { %s1223_s14 = smov [#allocation2]   ;;  %s1224_s16 = smov [#allocation5]  }
  0x11   : > { %s1475_s13 = scalar_select %p1321_p10, 1, 0 }
  0x12   : > { %s223_s15 = sshll.u32 %s1223_s14, 4  ;;  %p1025_p11 = pneg %p1321_p10  ;;  %s224_s15 = int_to_ptr.vmem [resolvable:$true] %s223_s15 }
  0x13   : > { %s239_s17 = sshll.u32 %s1224_s16, 4  ;;  %s1112_s19 = scalar_lea.vmem %s224_s15, 64  ;;  %s240_s17 = int_to_ptr.vmem [resolvable:$true] %s239_s17 }
  0x14   : > { %p1329_p12 = pnand %p1470_p9, %p1025_p11  ;;  %p1113_p0 = scmp.ne.s32.totalorder %s224_s15, %s1112_s19 }
  0x15   : > { %p1120_p3 = scmp.lt.s32.totalorder %s224_s15, %s224_s15  ;;  %p1121_p4 = scmp.lt.s32.totalorder %s1112_s19, %s1112_s19 }
  0x16   : > { %p1103_p13 = pneg %p1329_p12 }
  0x17   : > { %p1122_p7 = por %p1121_p4, %p1120_p3 }
  0x18   : > { %p1115_p1 = pnand %p1113_p0, %p1103_p13 }
  0x1a   : > { %p1116_p2 = pneg %p1115_p1 }
  0x1c   : > { %p1123_p8 = pnand %p1122_p7, %p1116_p2 }
  0x1e   : > { %1126 = shalt.err (!%p1123_p8)
}
  0x1f   : > { %1028 = dma.hbm_to_vmem [thread:$0]  (!%p1329_p12), %s1464_s2, 64, %s224_s15, [#allocation3]  }
  0x20   : > { %s1138_s22 = scalar_lea.vmem %s240_s17, 1024  ;;  %p1146_p0 = scmp.lt.s32.totalorder %s240_s17, %s240_s17 }
  0x21   : > { %p1139_p11 = scmp.ne.s32.totalorder %s240_s17, %s1138_s22  ;;  %p1147_p1 = scmp.lt.s32.totalorder %s1138_s22, %s1138_s22 }
  0x23   : > { %p1141_p9 = pnand %p1139_p11, %p1103_p13  ;;  %p1148_p5 = por %p1147_p1, %p1146_p0 }
  0x25   : > { %p1142_p6 = pneg %p1141_p9 }
  0x27   : > { %p1149_p10 = pnand %p1148_p5, %p1142_p6 }
  0x29   : > { %1152 = shalt.err (!%p1149_p10)
}
  0x2a   : > { %s1225_s23 = smov 64   ;;  %s1226_s29 = smov 4  }
  0x2b   : > { %1031 = dma.hbm_to_vmem [thread:$0]  (!%p1329_p12), %s1467_s5, 1024, %s240_s17, [#allocation6], %s1225_s23, %s1225_s23, %s1226_s29  }
  0x2c   : > { %p1477_p2 = scmp.ne.s32.totalorder %s1475_s13, 0 }
  0x2d   : > { %p1478_p3 = scmp.eq.s32.totalorder (!%p1477_p2), %s1293_s28, 0 }
  0x2e   : > { %276 = sbr.rel (%p1477_p2) target bundleno = 989 (0x3dd), region = 48 }
  0x33   : > { %1196 = dma.done.wait (%p1478_p3), [#allocation3], 64   ;;  %p1479_p9 = pmov %p1478_p3 }
  0x34   : > { %p1480_p5 = pmov %p1478_p3 }
  0x35   : > { %1198 = vsyncadd (%p1479_p9), [#allocation3], 4294967232 }
  0x36   : > { %1200 = dma.done.wait (%p1480_p5), [#allocation6], 1024   ;;  %p1481_p6 = pmov %p1478_p3 }
  0x37   : > { %s901_s14 = sshll.u32 %s1293_s28, 1  ;;  %vm345_vm0 = vcmask 1040384   ;;  %vm431_vm1 = vcmask 1043456   ;;  %v337_v0 = vld [vmem:[%s1465_s3 + $0x8] sm:$0x1]  ;;  %vm424_vm2 = vcmask 31744  }
  0x38   : > { %1202 = vsyncadd (%p1481_p6), [#allocation6], 4294966272  ;;  %p318_p10 = scmp.lt.s32.totalorder %s901_s14, 3  ;;  %v333_v1 = vld [vmem:[#allocation2] sm:$0xf]  ;;  %963 = vmatprep.subr.msk.mxu0 %vm345_vm0, %v337_v0  ;;  %vm338_vm3 = vcmask 72704  }
  0x39   : > { %970 = vmatprep.subr.msk.mxu1 %vm431_vm1, %v333_v1  ;;  %v336_v4 = vld [vmem:[%s1465_s3] sm:$0xff]  ;;  %964 = vmatpush3.msk.msra.mxu0 %vm345_vm0, %v337_v0  ;;  %v1081_v7 = vld [vmem:[%s1466_s4 + $0x38] sm:$0xff]   ;;  %v1227_v8 = vmov 0.0   ;;  %v1082_v9 = vld [vmem:[%s1466_s4 + $0x30] sm:$0xff]   ;;  %vm1228_vm4 = vmmov 0   ;;  %s314_s19 = sand.u32 1, %s1213_s25  }
  0x3a   : > { %s1489_s14 = smov (!%p318_p10, %s901_s14), 3  ;;  %971 = vmatpush3.msk.msra.mxu1 %vm431_vm1, %v333_v1  ;;  %965 = vmatprep.subr.mxu0 %v336_v4  ;;  %v1083_v10 = vld [vmem:[%s1466_s4 + $0x28] sm:$0xff]   ;;  %v1084_v11 = vld [vmem:[%s1466_s4 + $0x20] sm:$0xff]   ;;  %v1085_v12 = vld [vmem:[%s1466_s4 + $0x18] sm:$0xff]   ;;  %s900_s22 = sshll.u32 %s314_s19, 4 }
  0x3b   : > { %s902_s13 = sshll.u32 %s1489_s14, 3  ;;  %966 = vmatpush3.msra.mxu0 %v336_v4  ;;  %975 = vmatprep.subr.bf16.mxu1 %v1227_v8  ;;  %v1086_v13 = vld [vmem:[%s1466_s4 + $0x10] sm:$0xff]   ;;  %v1087_v14 = vld [vmem:[%s1466_s4 + $0x8] sm:$0xff]   ;;  %v1088_v15 = vld [vmem:[%s1466_s4] sm:$0xff]   ;;  %s937_s8 = sshll.u32 %s1293_s28, 8 }
  0x3c   : > { %s321_s17 = scalar_lea.vmem %s1462_s0, %s902_s13  ;;  %s327_s20 = scalar_lea.vmem %s1463_s1, %s902_s13  ;;  %995 = vmatprep.subr.bf16.mxu0 %v1227_v8  ;;  %v1089_v16 = vld [vmem:[#allocation5 + $0x38] sm:$0xff]   ;;  %v1090_v17 = vld [vmem:[#allocation5 + $0x30] sm:$0xff]   ;;  %v1091_v18 = vld [vmem:[#allocation5 + $0x28] sm:$0xff]  }
  0x3d   : > { %v331_v2 = vld [vmem:[%s321_s17] sm:$0xff]  ;;  %v332_v3 = vld [vmem:[%s321_s17 + $0x8] sm:$0xff]  ;;  %v1094_v33 = vld [vmem:[#allocation5 + $0x10] sm:$0xff]   ;;  %s316_s9 = scalar_lea.vmem [#allocation7], %s900_s22  ;;  %s1418_s16 = scalar_lea.hbm %s1469_s7, %s937_s8 }
  0x3e   : > { %v334_v5 = vld [vmem:[%s327_s20] sm:$0xff]  ;;  %v335_v6 = vld [vmem:[%s327_s20 + $0x8] sm:$0xff]  ;;  %972 = vmatprep.mubr.msk.f32.mxu1 %vm424_vm2, %v331_v2  ;;  %s796_s14 = sshll.u32 %s316_s9, 4  ;;  %s1422_s17 = scalar_lea.sflag [#allocation4], %s314_s19  ;;  %s1420_s14 = int_to_ptr.vmem [resolvable:$true] %s796_s14 }
  0x3f   : > { %973 = vmatmul.mubr.msk.f32.vlgmr.msra.gmra.mxu1 %vm424_vm2, %v332_v3  ;;  %967 = vmatprep.mubr.msk.f32.mxu0 %vm338_vm3, %v334_v5  ;;  %v1092_v19 = vld [vmem:[#allocation5 + $0x20] sm:$0xff]   ;;  %v1093_v20 = vld [vmem:[#allocation5 + $0x18] sm:$0xff]   ;;  %v1095_v34 = vld [vmem:[#allocation5 + $0x8] sm:$0xff]   ;;  %s1153_s18 = scalar_lea.vmem %s1420_s14, 256  ;;  %p1482_p13 = scmp.ne.s32.totalorder %s1473_s11, 0 }
  0x40   : > { %968 = vmatmul.mubr.msk.f32.vlgmr.msra.gmra.mxu0 %vm338_vm3, %v335_v6  ;;  %976 = vmatpush3.bf16.msra.mxu1 %v1081_v7  ;;  %v911_v23 = vld [vmem:[%s1468_s6] ss:$0 sm:$0xff]  ;;  %v1096_v35 = vld [vmem:[#allocation5] sm:$0xff]   ;;  %v912_v36 = vld [vmem:[%s1468_s6 + $0x1] ss:$0 sm:$0xff]  ;;  %p1154_p12 = scmp.ne.s32.totalorder %s1420_s14, %s1153_s18  ;;  %s1229_s28 = smov [#allocation7]  }
  0x41   : > { %977 = vmatprep.subr.bf16.mxu1 %v1227_v8  ;;  %991 = vmatprep.mubr.msk.bf16.mxu1 %vm1228_vm4, %v1227_v8  ;;  %v921_v46 = vld [vmem:[%s1468_s6 + $0x2] ss:$0 sm:$0xff]  ;;  %v930_v4 = vld [vmem:[%s1468_s6 + $0x3] ss:$0 sm:$0xff]  ;;  %v931_v6 = vld [vmem:[%s1468_s6 + $0x4] ss:$0 sm:$0xff] }
  0x42   : > { %1011 = vmatprep.mubr.msk.bf16.mxu0 %vm1228_vm4, %v1227_v8  ;;  %996 = vmatpush3.bf16.msra.mxu0 %v1089_v16  ;;  %p1155_p4 = pnand %p1154_p12, %p1482_p13  ;;  %s1157_s20 = sshll.u32 %s1229_s28, 4  ;;  %s1158_s20 = int_to_ptr.vmem [resolvable:$false] %s1157_s20 }
  0x43   : > { %997 = vmatprep.subr.bf16.mxu0 %v1227_v8  ;;  %s1159_s21 = scalar_lea.vmem %s1158_s20, 512  ;;  %p1160_p8 = scmp.lt.s32.totalorder %s1420_s14, %s1158_s20 }
  0x44   : > { %978 = vmatpush3.bf16.msra.mxu1 %v1082_v9  ;;  %p1156_p7 = pneg %p1155_p4  ;;  %p1161_p11 = scmp.lt.s32.totalorder %s1159_s21, %s1153_s18 }
  0x45   : > { %979 = vmatprep.subr.bf16.mxu1 %v1227_v8 }
  0x46   : > { %998 = vmatpush3.bf16.msra.mxu0 %v1090_v17  ;;  %p1162_p0 = por %p1161_p11, %p1160_p8 }
  0x47   : > { %999 = vmatprep.subr.bf16.mxu0 %v1227_v8 }
  0x48   : > { %980 = vmatpush3.bf16.msra.mxu1 %v1083_v10  ;;  %p1163_p1 = pnand %p1162_p0, %p1156_p7 }
  0x49   : > { %981 = vmatprep.subr.bf16.mxu1 %v1227_v8 }
  0x4a   : > { %1000 = vmatpush3.bf16.msra.mxu0 %v1091_v18 }
  0x4b   : > { %1001 = vmatprep.subr.bf16.mxu0 %v1227_v8 }
  0x4c   : > { %982 = vmatpush3.bf16.msra.mxu1 %v1084_v11 }
  0x4d   : > { %983 = vmatprep.subr.bf16.mxu1 %v1227_v8 }
  0x4e   : > { %1002 = vmatpush3.bf16.msra.mxu0 %v1092_v19 }
  0x4f   : > { %1003 = vmatprep.subr.bf16.mxu0 %v1227_v8 }
  0x50   : > { %984 = vmatpush3.bf16.msra.mxu1 %v1085_v12 }
  0x51   : > { %985 = vmatprep.subr.bf16.mxu1 %v1227_v8 }
  0x52   : > { %1004 = vmatpush3.bf16.msra.mxu0 %v1093_v20 }
  0x53   : > { %1005 = vmatprep.subr.bf16.mxu0 %v1227_v8 }
  0x54   : > { %986 = vmatpush3.bf16.msra.mxu1 %v1086_v13 }
  0x55   : > { %987 = vmatprep.subr.bf16.mxu1 %v1227_v8 }
  0x56   : > { %1006 = vmatpush3.bf16.msra.mxu0 %v1094_v33 }
  0x57   : > { %1007 = vmatprep.subr.bf16.mxu0 %v1227_v8 }
  0x58   : > { %988 = vmatpush3.bf16.msra.mxu1 %v1087_v14 }
  0x59   : > { %989 = vmatprep.subr.bf16.mxu1 %v1227_v8 }
  0x5a   : > { %1008 = vmatpush3.bf16.msra.mxu0 %v1095_v34 }
  0x5b   : > { %1009 = vmatprep.subr.bf16.mxu0 %v1227_v8 }
  0x5c   : > { %990 = vmatpush3.bf16.msra.mxu1 %v1088_v15 }
  0x5e   : > { %1010 = vmatpush3.bf16.msra.mxu0 %v1096_v35 }
  0xff   : > { %v974_v21 = vpop.f32.mrf.mxu1 }
 0x100   : > { %v969_v22 = vpop.f32.mrf.mxu0 }
 0x101   : > { %v507_v24 = vadd.f32 %v974_v21, %v969_v22  ;;  %v501_v25 = vpop.f32.mrf.mxu1 }
 0x102   : > { %v415_v26 = vpop.f32.mrf.mxu0 }
 0x103   : > { %v516_v27 = vadd.f32 %v911_v23, %v507_v24  ;;  %v502_v28 = vadd.f32 %v501_v25, %v415_v26 }
 0x105   : > { %v515_v29 = vadd.f32 %v911_v23, %v502_v28  ;;  %v518_v30 = vmax.f32 %v516_v27, 0.0 }
 0x107   : > { %v517_v31 = vmax.f32 %v515_v29, 0.0 }
 0x109   : > { %v519_v32 = vpack.c.bf16 %v518_v30, %v517_v31 }
 0x10b   : > { %992 = vmatmul.mubr.bf16.vlgmr.msra.gmra.mxu1 %v519_v32 }
 0x1cb   : > { %v623_v37 = vpop.f32.mrf.mxu1 }
 0x1cc   : > { %v624_v39 = vadd.f32 %v912_v36, %v623_v37 }
 0x1cd   : > { %v993_v38 = vpop.f32.mrf.mxu1 }
 0x1ce   : > { %v630_v43 = vmax.f32 %v624_v39, 0.0 }
 0x1cf   : > { %v626_v40 = vpop.f32.mrf.mxu1 }
 0x1d0   : > { %v627_v41 = vadd.f32 %v912_v36, %v626_v40 }
 0x1d1   : > { %v994_v42 = vpop.f32.mrf.mxu1 }
 0x1d2   : > { %v631_v44 = vmax.f32 %v627_v41, 0.0 }
 0x1d4   : > { %v632_v45 = vpack.c.bf16 %v631_v44, %v630_v43 }
 0x1d6   : > { %1012 = vmatmul.mubr.bf16.vlgmr.msra.gmra.mxu0 %v632_v45 }
 0x296   : > { %v736_v47 = vpop.f32.mrf.mxu0 }
 0x297   : > { %v737_v48 = vadd.f32 %v921_v46, %v736_v47 }
 0x298   : > { %v1013_v49 = vpop.f32.mrf.mxu0 }
 0x299   : > { %743 = vadd.xlane.f32.xlu0 %v737_v48 }
 0x29a   : > { %v739_v50 = vpop.f32.mrf.mxu0 }
 0x29b   : > { %v740_v51 = vadd.f32 %v921_v46, %v739_v50 }
 0x29c   : > { %v1014_v52 = vpop.f32.mrf.mxu0 }
 0x29d   : > { %745 = vadd.xlane.f32.xlu0 %v740_v51 }
 0x322   : > { %v744_v53 = vpop.xlane.xlu0 %743 }
 0x323   : > { %v748_v54 = vmul.f32 0.0078125, %v744_v53 }
 0x325   : > { %v750_v55 = vsub.f32 %v737_v48, %v748_v54 }
 0x326   : > { %v746_v56 = vpop.xlane.xlu0 %745 }
 0x327   : > { %v749_v57 = vmul.f32 0.0078125, %v746_v56  ;;  %v752_v58 = vmul.f32 %v750_v55, %v750_v55 }
 0x329   : > { %v751_v59 = vsub.f32 %v740_v51, %v749_v57  ;;  %754 = vadd.xlane.f32.xlu1 %v752_v58 }
 0x32b   : > { %v753_v60 = vmul.f32 %v751_v59, %v751_v59 }
 0x32d   : > { %756 = vadd.xlane.f32.xlu1 %v753_v60 }
 0x3b2   : > { %v755_v61 = vpop.xlane.xlu1 %754 }
 0x3b3   : > { %v758_v62 = vmul.f32 0.0078125, %v755_v61 }
 0x3b5   : > { %v760_v63 = vadd.f32 1e-05, %v758_v62 }
 0x3b6   : > { %v757_v0 = vpop.xlane.xlu1 %756 }
 0x3b7   : > { %1097 = vrsqrt.f32 %v760_v63  ;;  %v759_v1 = vmul.f32 0.0078125, %v757_v0 }
 0x3b9   : > { %v761_v2 = vadd.f32 1e-05, %v759_v1 }
 0x3bb   : > { %1099 = vrsqrt.f32 %v761_v2 }
 0x3c4   : > { %v1098_v3 = vpop.eup %1097 }
 0x3c5   : > { %v764_v5 = vmul.f32 %v1098_v3, %v750_v55 }
 0x3c7   : > { %v771_v7 = vmul.f32 %v930_v4, %v764_v5 }
 0x3c8   : > { %v1100_v8 = vpop.eup %1099 }
 0x3c9   : > { %v778_v9 = vadd.f32 %v931_v6, %v771_v7  ;;  %v765_v10 = vmul.f32 %v1100_v8, %v751_v59 }
 0x3cb   : > { %v772_v11 = vmul.f32 %v930_v4, %v765_v10  ;;  %780 = vst [vmem:[%s316_s9] sm:$0xff] %v778_v9 }
 0x3cd   : > { %v779_v12 = vadd.f32 %v931_v6, %v772_v11 }
 0x3cf   : > { %781 = vst [vmem:[%s316_s9 + $0x8] sm:$0xff] %v779_v12 }
 0x3d0   : > { %1166 = shalt.err (!%p1163_p1)
}
 0x3d1   : > { %s1167_s19 = scalar_lea.hbm %s1418_s16, 256  ;;  %s1171_s29 = scalar_lea.hbm %s1469_s7, 512 }
 0x3d2   : > { %p1168_p2 = scmp.ne.s32.totalorder %s1418_s16, %s1167_s19  ;;  %p1172_p5 = scmp.lt.s32.totalorder %s1418_s16, %s1469_s7 }
 0x3d3   : > { %p1173_p6 = scmp.lt.s32.totalorder %s1171_s29, %s1167_s19 }
 0x3d4   : > { %p1169_p3 = pnand %p1168_p2, %p1482_p13 }
 0x3d5   : > { %p1174_p10 = por %p1173_p6, %p1172_p5 }
 0x3d6   : > { %p1170_p9 = pneg %p1169_p3 }
 0x3d8   : > { %p1175_p12 = pnand %p1174_p10, %p1170_p9 }
 0x3da   : > { %1178 = shalt.err (!%p1175_p12)
}
 0x3db   : > { %s1230_s13 = smov 128   ;;  %s1231_s15 = smov 8  }
 0x3dc   : > { %1023 = dma.vmem_to_hbm [thread:$0]  (%p1482_p13), %s1420_s14, 256, %s1418_s16, %s1422_s17, %s1230_s13, %s1230_s13, %s1231_s15  }
 0x3dd PF: > { %p1040_p4 = scmp.ge.s32.totalorder %s1221_s27, 2  ;;  %s811_s18 = sand.u32 1, %s1209_s24  }
 0x3de   : > { %p1483_p7 = scmp.ne.s32.totalorder %s1474_s12, 0  ;;  %s812_s28 = scalar_lea.sflag [#allocation4], %s811_s18 }
 0x3e0   : > { %p1033_p8 = pnand %p1040_p4, %p1483_p7 }
 0x3e2   : > { %p1034_p11 = pneg %p1033_p8 }
 0x3e4   : > { %1204 = dma.done.wait (%p1034_p11), %s812_s28, 256  }
 0x3e5   : > { %1206 = vsyncadd (%p1034_p11), %s812_s28, 4294967040  ;;  %p19_p0 = scmp.ge.s32.totalorder %s1297_s30, 4   ;;  %s1484_s24 = smov %s1213_s25 }
 0x3e6   : > { %s1485_s25 = smov %s1217_s26  ;;  %s1486_s26 = smov %s1308_s10 }
 0x3e7   : > { %s1487_s27 = smov %s1297_s30  ;;  %21 = sbr.rel (!%p19_p0) target bundleno = 5 (0x5), region = 95 }
 0x3ec   :  { %817 = vsyncpa [#allocation3], 1 }
 0x3ed   :  { %819 = vsyncpa [#allocation3 + $0x1], 1 }
 0x3ee   :  { %820 = vsyncpa [#allocation6], 1 }
 0x3ef   :  { %821 = vsyncpa [#allocation4], 1 }
 0x3f0   :  { %823 = vsyncpa [#allocation4 + $0x1], 1 }

</bundles_post_ra>
